<compile_context>
chip_gen: v7x
topology: tpu7x:2x2x1
jax: 0.10.0
libtpu: 0.0.40
codegen_flags: <defaults>
</compile_context>

<pallas_src>
import math
from functools import partial

import jax
import jax.numpy as jnp
from jax.experimental import pallas as pl
from jax.experimental.pallas import tpu as pltpu


def _mha_pool_kernel(tb, seq, num_heads,
                     x_ref, mask_ref, qbd_ref,
                     wk_ref, bk_ref, wv_ref, bv_ref,
                     wo_ref, bo_ref, e_ref, sel_ref, o_ref):
    """One grid step = TB batch elements.

    x_ref   : (TB, S, H)    hidden states tile (input dtype)
    mask_ref: (TB*S, 1)     additive key-padding mask (0 valid / -1e30 padded), f32
    qbd_ref : (H, nh)       block-diagonal learnable query, scale 1/sqrt(hd) folded in
    wk/wv/wo: (H, H)        projection weights, pre-transposed (y = x @ W), input dtype
    bk/bv/bo: (1, H)        biases, f32
    e_ref   : (nh, H)       0/1 head-expansion matrix (E[h, h*hd+d] = 1), f32
    sel_ref : (TB, TB*S)    0/1 per-batch segment-sum matrix (sel[b, b*S+s] = 1), f32
    o_ref   : (TB, H)       pooled output tile
    """
    hidden = x_ref.shape[-1]
    rows = tb * seq
    cdt = x_ref.dtype                                   # native compute dtype (bf16-friendly)

    x2 = x_ref[...].reshape(rows, hidden)               # (TB*S, H)

    # K / V projections: one big MXU matmul each, f32 accumulation.
    k = jnp.dot(x2, wk_ref[...], preferred_element_type=jnp.float32) + bk_ref[...]
    v = jnp.dot(x2, wv_ref[...], preferred_element_type=jnp.float32) + bv_ref[...]

    # Scores for all heads in one MXU matmul (scale pre-folded into q_bd),
    # plus one broadcast add of the additive padding mask.
    s = jnp.dot(k.astype(cdt), qbd_ref[...], preferred_element_type=jnp.float32)
    s = s + mask_ref[...]                                # (TB*S, nh)

    # Per-(batch, head) softmax over the sequence (single max/exp/sum for all heads).
    s3 = s.reshape(tb, seq, num_heads)
    m = jnp.max(s3, axis=1, keepdims=True)               # (TB, 1, nh)
    p3 = jnp.exp(s3 - m)                                  # (TB, S, nh)
    denom = jnp.sum(p3, axis=1)                           # (TB, nh)
    p = p3.reshape(rows, num_heads)                       # (TB*S, nh)

    # Expand per-head probs across head_dim lanes on the MXU (E is 0/1).
    pe = jnp.dot(p, e_ref[...], preferred_element_type=jnp.float32)          # (TB*S, H)
    # Segment-sum over the sequence on the MXU via the 0/1 selection matrix.
    ctx_num = jnp.dot(sel_ref[...], pe * v, preferred_element_type=jnp.float32)  # (TB, H)

    # Normalize: reciprocal on the EUP, head-expanded on the MXU.
    inv = pl.reciprocal(denom, approx=True)                                   # (TB, nh)
    inv_full = jnp.dot(inv, e_ref[...], preferred_element_type=jnp.float32)   # (TB, H)
    ctx = ctx_num * inv_full

    out = jnp.dot(ctx.astype(cdt), wo_ref[...],
                  preferred_element_type=jnp.float32) + bo_ref[...]
    o_ref[...] = out.astype(o_ref.dtype)


def _pick_batch_tile(batch, seq, hidden, itemsize):
    """Largest batch tile TB such that
       - TB divides batch and (TB == batch or TB % 8 == 0)  (sublane/block rule),
       - the estimated per-step VMEM working set stays v7x-safe (64 MiB chip),
       - growth stops once the MXU row count (TB*S) is saturated (~512 rows)."""
    budget = 24 * 1024 * 1024          # conservative: leaves headroom on v7x's 64 MiB VMEM
    best = None
    for tb in range(1, batch + 1):
        if batch % tb:
            continue
        if not (tb == batch or tb % 8 == 0):
            continue
        rows = tb * seq
        # double-buffered input tile + live f32 intermediates (k, v, pe, pe*v, scores)
        est = 2 * rows * hidden * itemsize + 5 * rows * hidden * 4
        if est > budget and best is not None:
            break
        best = tb
        if rows >= 512:
            break
    return best if best is not None else batch


def _make_specs(tb, seq, hidden, num_heads, single_buffer_consts):
    """BlockSpecs: batch-tiled activations; weights/biases as grid-invariant blocks
    (optionally single-buffered to avoid wasting VMEM on double buffers)."""
    const_kw = {"pipeline_mode": pl.Buffered(1)} if single_buffer_consts else {}

    def cspec(shape):
        return pl.BlockSpec(shape, lambda b, _n=len(shape): (0,) * _n, **const_kw)

    in_specs = [
        pl.BlockSpec((tb, seq, hidden), lambda b: (b, 0, 0)),   # hidden_states tile
        pl.BlockSpec((tb * seq, 1), lambda b: (b, 0)),          # additive mask tile
        cspec((hidden, num_heads)),                             # q_bd
        cspec((hidden, hidden)),                                # wk_t
        cspec((1, hidden)),                                     # bk
        cspec((hidden, hidden)),                                # wv_t
        cspec((1, hidden)),                                     # bv
        cspec((hidden, hidden)),                                # wo_t
        cspec((1, hidden)),                                     # bo
        cspec((num_heads, hidden)),                             # E (head expansion)
        cspec((tb, tb * seq)),                                  # sel (segment sum)
    ]
    out_spec = pl.BlockSpec((tb, hidden), lambda b: (b, 0))
    return in_specs, out_spec


def multi_head_attention_pooling(hidden_states, attention_mask, params, num_heads):
    """Pallas wrapper.  hidden_states: (B, S, H); attention_mask: (B, S)."""
    B, S, H = hidden_states.shape
    head_dim = H // num_heads
    wdt = hidden_states.dtype                      # keep MXU operands in the input dtype

    # --- parameter plumbing (tiny, once, plain JAX) ---
    wq = params["in_proj_weight"][0 * H:1 * H]
    wk = params["in_proj_weight"][1 * H:2 * H]
    wv = params["in_proj_weight"][2 * H:3 * H]
    bq = params["in_proj_bias"][0 * H:1 * H]
    bk = params["in_proj_bias"][1 * H:2 * H]
    bv = params["in_proj_bias"][2 * H:3 * H]
    wo = params["out_proj_weight"]
    bo = params["out_proj_bias"]

    # query projection: query (1,1,H) is batch-independent (it is .expand()'ed)
    q_proj = (params["query"].reshape(1, H).astype(jnp.float32)
              @ wq.T.astype(jnp.float32) + bq.astype(jnp.float32))       # (1, H)

    # block-diagonal query (scale folded in) and 0/1 head-expansion matrix
    head_of_dim = jnp.arange(H, dtype=jnp.int32) // head_dim
    onehot = (head_of_dim[:, None] == jnp.arange(num_heads, dtype=jnp.int32)[None, :])
    onehot_f = onehot.astype(jnp.float32)                                 # (H, nh)
    scale = jnp.float32(1.0 / math.sqrt(head_dim))
    q_bd = (q_proj.reshape(H, 1) * onehot_f * scale).astype(wdt)          # (H, nh)
    e_mat = onehot_f.T                                                    # (nh, H), f32

    # weights stay in the activation dtype (bf16-native MXU); f32 accumulation in-kernel
    wk_t = wk.T.astype(wdt)
    wv_t = wv.T.astype(wdt)
    wo_t = wo.T.astype(wdt)
    bk2 = bk.reshape(1, H).astype(jnp.float32)
    bv2 = bv.reshape(1, H).astype(jnp.float32)
    bo2 = bo.reshape(1, H).astype(jnp.float32)

    # additive key-padding mask: 0 for valid, -1e30 for padded, shaped (B*S, 1)
    mask_add = jnp.where(attention_mask.reshape(B * S, 1) > 0,
                         0.0, -1e30).astype(jnp.float32)

    tb = _pick_batch_tile(B, S, H, jnp.dtype(wdt).itemsize)
    rows = tb * S
    sel = (jnp.arange(tb)[:, None] ==
           (jnp.arange(rows) // S)[None, :]).astype(jnp.float32)          # (tb, tb*S)

    kernel = partial(_mha_pool_kernel, tb, S, num_heads)
    args = (hidden_states, mask_add, q_bd,
            wk_t, bk2, wv_t, bv2, wo_t, bo2, e_mat, sel)

    def build(single_buffer_consts):
        in_specs, out_spec = _make_specs(tb, S, H, num_heads, single_buffer_consts)
        return pl.pallas_call(
            kernel,
            out_shape=jax.ShapeDtypeStruct((B, H), hidden_states.dtype),
            grid=(B // tb,),
            in_specs=in_specs,
            out_specs=out_spec,
            compiler_params=pltpu.CompilerParams(
                dimension_semantics=("parallel",)),   # batch-tile axis -> megacore/2-TC sharding
        )

    try:
        # preferred: grid-invariant weights single-buffered (saves ~3*H*H*dtype of VMEM)
        return build(True)(*args)
    except Exception:
        # fallback if pl.Buffered(1) is not supported by this backend/version
        return build(False)(*args)


def _reference(hidden_states, attention_mask, params, num_heads):
    """Pure-JAX replica of the PyTorch forward (eval mode), for validation."""
    B, S, H = hidden_states.shape
    hd = H // num_heads
    wq = params["in_proj_weight"][0 * H:1 * H]
    wk = params["in_proj_weight"][1 * H:2 * H]
    wv = params["in_proj_weight"][2 * H:3 * H]
    bq = params["in_proj_bias"][0 * H:1 * H]
    bk = params["in_proj_bias"][1 * H:2 * H]
    bv = params["in_proj_bias"][2 * H:3 * H]
    q = params["query"].reshape(1, H) @ wq.T + bq            # (1, H)
    k = hidden_states @ wk.T + bk                            # (B, S, H)
    v = hidden_states @ wv.T + bv
    qh = q.reshape(1, num_heads, hd).transpose(1, 0, 2)      # (nh, 1, hd)
    kh = k.reshape(B, S, num_heads, hd).transpose(0, 2, 1, 3)
    vh = v.reshape(B, S, num_heads, hd).transpose(0, 2, 1, 3)
    scores = jnp.einsum("hqd,bhkd->bhqk", qh, kh) / math.sqrt(hd)
    pad = (attention_mask == 0)[:, None, None, :]
    scores = jnp.where(pad, -1e30, scores)
    p = jax.nn.softmax(scores, axis=-1)
    ctx = jnp.einsum("bhqk,bhkd->bhqd", p, vh)               # (B, nh, 1, hd)
    ctx = ctx.transpose(0, 2, 1, 3).reshape(B, H)
    return ctx @ params["out_proj_weight"].T + params["out_proj_bias"]


if __name__ == "__main__":
    B, S, H, NUM_HEADS = 2, 8, 32, 4

    key = jax.random.PRNGKey(0)
    k1, k2, k3, k4, k5, k6 = jax.random.split(key, 6)

    params = {
        "query": jax.random.normal(k1, (1, 1, H), jnp.float32),
        "in_proj_weight": jax.random.normal(k2, (3 * H, H), jnp.float32) * 0.1,
        "in_proj_bias": jax.random.normal(k3, (3 * H,), jnp.float32) * 0.1,
        "out_proj_weight": jax.random.normal(k4, (H, H), jnp.float32) * 0.1,
        "out_proj_bias": jax.random.normal(k5, (H,), jnp.float32) * 0.1,
    }

    hidden_states = jax.random.normal(k6, (B, S, H), jnp.float32)
    # mask: first row fully valid, second row has last 3 positions padded
    attention_mask = jnp.ones((B, S), jnp.int32).at[1, S - 3:].set(0)

    out = multi_head_attention_pooling(hidden_states, attention_mask, params, NUM_HEADS)
    out = jax.block_until_ready(out)

    ref = _reference(hidden_states, attention_mask, params, NUM_HEADS)
    assert out.shape == (B, H)
    # tolerance accounts for the EUP approximate reciprocal in the softmax denom
    err = float(jnp.max(jnp.abs(out - ref)))
    assert err < 5e-3, f"mismatch vs reference: {err}"

    # TODO(synk): attention dropout (p=0.1) is training-only; eval forward implemented.
    print("KERNEL_OK")
</pallas_src>

<mosaic_0001>
module attributes {stable_mosaic.version = 11 : i64} {
  func.func @_mha_pool_kernel(%arg0: i32, %arg1: memref<2x8x32xf32, #tpu.memory_space<vmem>>, %arg2: memref<16x1xf32, #tpu.memory_space<vmem>>, %arg3: memref<32x4xf32, #tpu.memory_space<vmem>>, %arg4: memref<32x32xf32, #tpu.memory_space<vmem>>, %arg5: memref<1x32xf32, #tpu.memory_space<vmem>>, %arg6: memref<32x32xf32, #tpu.memory_space<vmem>>, %arg7: memref<1x32xf32, #tpu.memory_space<vmem>>, %arg8: memref<32x32xf32, #tpu.memory_space<vmem>>, %arg9: memref<1x32xf32, #tpu.memory_space<vmem>>, %arg10: memref<4x32xf32, #tpu.memory_space<vmem>>, %arg11: memref<2x16xf32, #tpu.memory_space<vmem>>, %arg12: memref<2x32xf32, #tpu.memory_space<vmem>>) attributes {dimension_semantics = [#tpu.dimension_semantics<parallel>], iteration_bounds = array<i64: 1>, scalar_prefetch = 0 : i64, scratch_operands = 0 : i64, tpu.core_type = #tpu.core_type<tc>, window_params = [{transform_indices = @transform_0, window_bounds = array<i64: 2, 8, 32>}, {transform_indices = @transform_1, window_bounds = array<i64: 16, 1>}, {pipeline_mode = #tpu.pipeline_mode<synchronous>, transform_indices = @transform_2, window_bounds = array<i64: 32, 4>}, {pipeline_mode = #tpu.pipeline_mode<synchronous>, transform_indices = @transform_3, window_bounds = array<i64: 32, 32>}, {pipeline_mode = #tpu.pipeline_mode<synchronous>, transform_indices = @transform_4, window_bounds = array<i64: 1, 32>}, {pipeline_mode = #tpu.pipeline_mode<synchronous>, transform_indices = @transform_5, window_bounds = array<i64: 32, 32>}, {pipeline_mode = #tpu.pipeline_mode<synchronous>, transform_indices = @transform_6, window_bounds = array<i64: 1, 32>}, {pipeline_mode = #tpu.pipeline_mode<synchronous>, transform_indices = @transform_7, window_bounds = array<i64: 32, 32>}, {pipeline_mode = #tpu.pipeline_mode<synchronous>, transform_indices = @transform_8, window_bounds = array<i64: 1, 32>}, {pipeline_mode = #tpu.pipeline_mode<synchronous>, transform_indices = @transform_9, window_bounds = array<i64: 4, 32>}, {pipeline_mode = #tpu.pipeline_mode<synchronous>, transform_indices = @transform_10, window_bounds = array<i64: 2, 16>}, {transform_indices = @transform_11, window_bounds = array<i64: 2, 32>}]} {
    %c0 = arith.constant 0 : index
    %c0_0 = arith.constant 0 : index
    %c0_1 = arith.constant 0 : index
    %0 = vector.load %arg1[%c0, %c0_0, %c0_1] : memref<2x8x32xf32, #tpu.memory_space<vmem>>, vector<2x8x32xf32>
    %1 = vector.shape_cast %0 : vector<2x8x32xf32> to vector<16x32xf32>
    %c0_2 = arith.constant 0 : index
    %c0_3 = arith.constant 0 : index
    %2 = vector.load %arg4[%c0_2, %c0_3] : memref<32x32xf32, #tpu.memory_space<vmem>>, vector<32x32xf32>
    %cst = arith.constant dense<0.000000e+00> : vector<16x32xf32>
    %3 = tpu.matmul %1, %2, %cst {dimension_numbers = #tpu.dot_dimension_numbers<[1], [0], [0], [1], [0, 0, 1, 1], [], []>} : vector<16x32xf32>, vector<32x32xf32>, vector<16x32xf32> -> vector<16x32xf32>
    %c0_4 = arith.constant 0 : index
    %c0_5 = arith.constant 0 : index
    %4 = vector.load %arg5[%c0_4, %c0_5] : memref<1x32xf32, #tpu.memory_space<vmem>>, vector<1x32xf32>
    %5 = vector.broadcast %4 : vector<1x32xf32> to vector<16x32xf32>
    %6 = arith.addf %3, %5 : vector<16x32xf32>
    %c0_6 = arith.constant 0 : index
    %c0_7 = arith.constant 0 : index
    %7 = vector.load %arg6[%c0_6, %c0_7] : memref<32x32xf32, #tpu.memory_space<vmem>>, vector<32x32xf32>
    %cst_8 = arith.constant dense<0.000000e+00> : vector<16x32xf32>
    %8 = tpu.matmul %1, %7, %cst_8 {dimension_numbers = #tpu.dot_dimension_numbers<[1], [0], [0], [1], [0, 0, 1, 1], [], []>} : vector<16x32xf32>, vector<32x32xf32>, vector<16x32xf32> -> vector<16x32xf32>
    %c0_9 = arith.constant 0 : index
    %c0_10 = arith.constant 0 : index
    %9 = vector.load %arg7[%c0_9, %c0_10] : memref<1x32xf32, #tpu.memory_space<vmem>>, vector<1x32xf32>
    %10 = vector.broadcast %9 : vector<1x32xf32> to vector<16x32xf32>
    %11 = arith.addf %8, %10 : vector<16x32xf32>
    %c0_11 = arith.constant 0 : index
    %c0_12 = arith.constant 0 : index
    %12 = vector.load %arg3[%c0_11, %c0_12] : memref<32x4xf32, #tpu.memory_space<vmem>>, vector<32x4xf32>
    %cst_13 = arith.constant dense<0.000000e+00> : vector<16x4xf32>
    %13 = tpu.matmul %6, %12, %cst_13 {dimension_numbers = #tpu.dot_dimension_numbers<[1], [0], [0], [1], [0, 0, 1, 1], [], []>} : vector<16x32xf32>, vector<32x4xf32>, vector<16x4xf32> -> vector<16x4xf32>
    %c0_14 = arith.constant 0 : index
    %c0_15 = arith.constant 0 : index
    %14 = vector.load %arg2[%c0_14, %c0_15] : memref<16x1xf32, #tpu.memory_space<vmem>>, vector<16x1xf32>
    %15 = vector.broadcast %14 : vector<16x1xf32> to vector<16x4xf32>
    %16 = arith.addf %13, %15 : vector<16x4xf32>
    %17 = vector.shape_cast %16 : vector<16x4xf32> to vector<2x8x4xf32>
    %cst_16 = arith.constant dense<0xFF800000> : vector<2x4xf32>
    %18 = vector.multi_reduction <maximumf>, %17, %cst_16 [1] : vector<2x8x4xf32> to vector<2x4xf32>
    %19 = vector.shape_cast %18 : vector<2x4xf32> to vector<2x1x4xf32>
    %20 = vector.broadcast %19 : vector<2x1x4xf32> to vector<2x8x4xf32>
    %21 = arith.subf %17, %20 : vector<2x8x4xf32>
    %22 = math.exp %21 : vector<2x8x4xf32>
    %cst_17 = arith.constant dense<0.000000e+00> : vector<2x4xf32>
    %23 = vector.multi_reduction <add>, %22, %cst_17 [1] : vector<2x8x4xf32> to vector<2x4xf32>
    %24 = vector.shape_cast %22 : vector<2x8x4xf32> to vector<16x4xf32>
    %c0_18 = arith.constant 0 : index
    %c0_19 = arith.constant 0 : index
    %25 = vector.load %arg10[%c0_18, %c0_19] : memref<4x32xf32, #tpu.memory_space<vmem>>, vector<4x32xf32>
    %cst_20 = arith.constant dense<0.000000e+00> : vector<16x32xf32>
    %26 = tpu.matmul %24, %25, %cst_20 {dimension_numbers = #tpu.dot_dimension_numbers<[1], [0], [0], [1], [0, 0, 1, 1], [], []>} : vector<16x4xf32>, vector<4x32xf32>, vector<16x32xf32> -> vector<16x32xf32>
    %c0_21 = arith.constant 0 : index
    %c0_22 = arith.constant 0 : index
    %27 = vector.load %arg11[%c0_21, %c0_22] : memref<2x16xf32, #tpu.memory_space<vmem>>, vector<2x16xf32>
    %28 = arith.mulf %26, %11 : vector<16x32xf32>
    %cst_23 = arith.constant dense<0.000000e+00> : vector<2x32xf32>
    %29 = tpu.matmul %27, %28, %cst_23 {dimension_numbers = #tpu.dot_dimension_numbers<[1], [0], [0], [1], [0, 0, 1, 1], [], []>} : vector<2x16xf32>, vector<16x32xf32>, vector<2x32xf32> -> vector<2x32xf32>
    %30 = tpu.reciprocal %23 {approx = true} : vector<2x4xf32> -> vector<2x4xf32>
    %c0_24 = arith.constant 0 : index
    %c0_25 = arith.constant 0 : index
    %31 = vector.load %arg10[%c0_24, %c0_25] : memref<4x32xf32, #tpu.memory_space<vmem>>, vector<4x32xf32>
    %cst_26 = arith.constant dense<0.000000e+00> : vector<2x32xf32>
    %32 = tpu.matmul %30, %31, %cst_26 {dimension_numbers = #tpu.dot_dimension_numbers<[1], [0], [0], [1], [0, 0, 1, 1], [], []>} : vector<2x4xf32>, vector<4x32xf32>, vector<2x32xf32> -> vector<2x32xf32>
    %33 = arith.mulf %29, %32 : vector<2x32xf32>
    %c0_27 = arith.constant 0 : index
    %c0_28 = arith.constant 0 : index
    %34 = vector.load %arg8[%c0_27, %c0_28] : memref<32x32xf32, #tpu.memory_space<vmem>>, vector<32x32xf32>
    %cst_29 = arith.constant dense<0.000000e+00> : vector<2x32xf32>
    %35 = tpu.matmul %33, %34, %cst_29 {dimension_numbers = #tpu.dot_dimension_numbers<[1], [0], [0], [1], [0, 0, 1, 1], [], []>} : vector<2x32xf32>, vector<32x32xf32>, vector<2x32xf32> -> vector<2x32xf32>
    %c0_30 = arith.constant 0 : index
    %c0_31 = arith.constant 0 : index
    %36 = vector.load %arg9[%c0_30, %c0_31] : memref<1x32xf32, #tpu.memory_space<vmem>>, vector<1x32xf32>
    %37 = vector.broadcast %36 : vector<1x32xf32> to vector<2x32xf32>
    %38 = arith.addf %35, %37 : vector<2x32xf32>
    %c0_32 = arith.constant 0 : index
    %c0_33 = arith.constant 0 : index
    %39 = vector.load %arg12[%c0_32, %c0_33] : memref<2x32xf32, #tpu.memory_space<vmem>>, vector<2x32xf32>
    tpu.vector_store %arg12[%c0_32, %c0_33], %38 {strides = array<i32>} : memref<2x32xf32, #tpu.memory_space<vmem>>, vector<2x32xf32>,
    return
  }
  func.func @transform_0(%arg0: i32) -> (i32, i32, i32) {
    %c0_i32 = arith.constant 0 : i32
    %c0_i32_0 = arith.constant 0 : i32
    %c0_i32_1 = arith.constant 0 : i32
    return %arg0, %c0_i32, %c0_i32_0 : i32, i32, i32
  }
  func.func @transform_1(%arg0: i32) -> (i32, i32) {
    %c0_i32 = arith.constant 0 : i32
    %c0_i32_0 = arith.constant 0 : i32
    return %arg0, %c0_i32 : i32, i32
  }
  func.func @transform_2(%arg0: i32) -> (i32, i32) {
    %c0_i32 = arith.constant 0 : i32
    %c0_i32_0 = arith.constant 0 : i32
    %c0_i32_1 = arith.constant 0 : i32
    return %c0_i32, %c0_i32_0 : i32, i32
  }
  func.func @transform_3(%arg0: i32) -> (i32, i32) {
    %c0_i32 = arith.constant 0 : i32
    %c0_i32_0 = arith.constant 0 : i32
    %c0_i32_1 = arith.constant 0 : i32
    return %c0_i32, %c0_i32_0 : i32, i32
  }
  func.func @transform_4(%arg0: i32) -> (i32, i32) {
    %c0_i32 = arith.constant 0 : i32
    %c0_i32_0 = arith.constant 0 : i32
    %c0_i32_1 = arith.constant 0 : i32
    return %c0_i32, %c0_i32_0 : i32, i32
  }
  func.func @transform_5(%arg0: i32) -> (i32, i32) {
    %c0_i32 = arith.constant 0 : i32
    %c0_i32_0 = arith.constant 0 : i32
    %c0_i32_1 = arith.constant 0 : i32
    return %c0_i32, %c0_i32_0 : i32, i32
  }
  func.func @transform_6(%arg0: i32) -> (i32, i32) {
    %c0_i32 = arith.constant 0 : i32
    %c0_i32_0 = arith.constant 0 : i32
    %c0_i32_1 = arith.constant 0 : i32
    return %c0_i32, %c0_i32_0 : i32, i32
  }
  func.func @transform_7(%arg0: i32) -> (i32, i32) {
    %c0_i32 = arith.constant 0 : i32
    %c0_i32_0 = arith.constant 0 : i32
    %c0_i32_1 = arith.constant 0 : i32
    return %c0_i32, %c0_i32_0 : i32, i32
  }
  func.func @transform_8(%arg0: i32) -> (i32, i32) {
    %c0_i32 = arith.constant 0 : i32
    %c0_i32_0 = arith.constant 0 : i32
    %c0_i32_1 = arith.constant 0 : i32
    return %c0_i32, %c0_i32_0 : i32, i32
  }
  func.func @transform_9(%arg0: i32) -> (i32, i32) {
    %c0_i32 = arith.constant 0 : i32
    %c0_i32_0 = arith.constant 0 : i32
    %c0_i32_1 = arith.constant 0 : i32
    return %c0_i32, %c0_i32_0 : i32, i32
  }
  func.func @transform_10(%arg0: i32) -> (i32, i32) {
    %c0_i32 = arith.constant 0 : i32
    %c0_i32_0 = arith.constant 0 : i32
    %c0_i32_1 = arith.constant 0 : i32
    return %c0_i32, %c0_i32_0 : i32, i32
  }
  func.func @transform_11(%arg0: i32) -> (i32, i32) {
    %c0_i32 = arith.constant 0 : i32
    %c0_i32_0 = arith.constant 0 : i32
    return %arg0, %c0_i32 : i32, i32
  }
}

module attributes {stable_mosaic.version = 11 : i64} {
  func.func @_mha_pool_kernel(%arg0: i32, %arg1: memref<2x8x32xf32, #tpu.memory_space<vmem>>, %arg2: memref<16x1xf32, #tpu.memory_space<vmem>>, %arg3: memref<32x4xf32, #tpu.memory_space<vmem>>, %arg4: memref<32x32xf32, #tpu.memory_space<vmem>>, %arg5: memref<1x32xf32, #tpu.memory_space<vmem>>, %arg6: memref<32x32xf32, #tpu.memory_space<vmem>>, %arg7: memref<1x32xf32, #tpu.memory_space<vmem>>, %arg8: memref<32x32xf32, #tpu.memory_space<vmem>>, %arg9: memref<1x32xf32, #tpu.memory_space<vmem>>, %arg10: memref<4x32xf32, #tpu.memory_space<vmem>>, %arg11: memref<2x16xf32, #tpu.memory_space<vmem>>, %arg12: memref<2x32xf32, #tpu.memory_space<vmem>>) attributes {dimension_semantics = [#tpu.dimension_semantics<parallel>], iteration_bounds = array<i64: 1>, scalar_prefetch = 0 : i64, scratch_operands = 0 : i64, tpu.core_type = #tpu.core_type<tc>, window_params = [{transform_indices = @transform_0, window_bounds = array<i64: 2, 8, 32>}, {transform_indices = @transform_1, window_bounds = array<i64: 16, 1>}, {pipeline_mode = #tpu.pipeline_mode<synchronous>, transform_indices = @transform_2, window_bounds = array<i64: 32, 4>}, {pipeline_mode = #tpu.pipeline_mode<synchronous>, transform_indices = @transform_3, window_bounds = array<i64: 32, 32>}, {pipeline_mode = #tpu.pipeline_mode<synchronous>, transform_indices = @transform_4, window_bounds = array<i64: 1, 32>}, {pipeline_mode = #tpu.pipeline_mode<synchronous>, transform_indices = @transform_5, window_bounds = array<i64: 32, 32>}, {pipeline_mode = #tpu.pipeline_mode<synchronous>, transform_indices = @transform_6, window_bounds = array<i64: 1, 32>}, {pipeline_mode = #tpu.pipeline_mode<synchronous>, transform_indices = @transform_7, window_bounds = array<i64: 32, 32>}, {pipeline_mode = #tpu.pipeline_mode<synchronous>, transform_indices = @transform_8, window_bounds = array<i64: 1, 32>}, {pipeline_mode = #tpu.pipeline_mode<synchronous>, transform_indices = @transform_9, window_bounds = array<i64: 4, 32>}, {pipeline_mode = #tpu.pipeline_mode<synchronous>, transform_indices = @transform_10, window_bounds = array<i64: 2, 16>}, {transform_indices = @transform_11, window_bounds = array<i64: 2, 32>}]} {
    %c0 = arith.constant 0 : index
    %c0_0 = arith.constant 0 : index
    %c0_1 = arith.constant 0 : index
    %0 = vector.load %arg1[%c0, %c0_0, %c0_1] : memref<2x8x32xf32, #tpu.memory_space<vmem>>, vector<2x8x32xf32>
    %1 = vector.shape_cast %0 : vector<2x8x32xf32> to vector<16x32xf32>
    %c0_2 = arith.constant 0 : index
    %c0_3 = arith.constant 0 : index
    %2 = vector.load %arg4[%c0_2, %c0_3] : memref<32x32xf32, #tpu.memory_space<vmem>>, vector<32x32xf32>
    %cst = arith.constant dense<0.000000e+00> : vector<16x32xf32>
    %3 = tpu.matmul %1, %2, %cst {dimension_numbers = #tpu.dot_dimension_numbers<[1], [0], [0], [1], [0, 0, 1, 1], [], []>} : vector<16x32xf32>, vector<32x32xf32>, vector<16x32xf32> -> vector<16x32xf32>
    %c0_4 = arith.constant 0 : index
    %c0_5 = arith.constant 0 : index
    %4 = vector.load %arg5[%c0_4, %c0_5] : memref<1x32xf32, #tpu.memory_space<vmem>>, vector<1x32xf32>
    %5 = vector.broadcast %4 : vector<1x32xf32> to vector<16x32xf32>
    %6 = arith.addf %3, %5 : vector<16x32xf32>
    %c0_6 = arith.constant 0 : index
    %c0_7 = arith.constant 0 : index
    %7 = vector.load %arg6[%c0_6, %c0_7] : memref<32x32xf32, #tpu.memory_space<vmem>>, vector<32x32xf32>
    %cst_8 = arith.constant dense<0.000000e+00> : vector<16x32xf32>
    %8 = tpu.matmul %1, %7, %cst_8 {dimension_numbers = #tpu.dot_dimension_numbers<[1], [0], [0], [1], [0, 0, 1, 1], [], []>} : vector<16x32xf32>, vector<32x32xf32>, vector<16x32xf32> -> vector<16x32xf32>
    %c0_9 = arith.constant 0 : index
    %c0_10 = arith.constant 0 : index
    %9 = vector.load %arg7[%c0_9, %c0_10] : memref<1x32xf32, #tpu.memory_space<vmem>>, vector<1x32xf32>
    %10 = vector.broadcast %9 : vector<1x32xf32> to vector<16x32xf32>
    %11 = arith.addf %8, %10 : vector<16x32xf32>
    %c0_11 = arith.constant 0 : index
    %c0_12 = arith.constant 0 : index
    %12 = vector.load %arg3[%c0_11, %c0_12] : memref<32x4xf32, #tpu.memory_space<vmem>>, vector<32x4xf32>
    %cst_13 = arith.constant dense<0.000000e+00> : vector<16x4xf32>
    %13 = tpu.matmul %6, %12, %cst_13 {dimension_numbers = #tpu.dot_dimension_numbers<[1], [0], [0], [1], [0, 0, 1, 1], [], []>} : vector<16x32xf32>, vector<32x4xf32>, vector<16x4xf32> -> vector<16x4xf32>
    %c0_14 = arith.constant 0 : index
    %c0_15 = arith.constant 0 : index
    %14 = vector.load %arg2[%c0_14, %c0_15] : memref<16x1xf32, #tpu.memory_space<vmem>>, vector<16x1xf32>
    %15 = vector.broadcast %14 : vector<16x1xf32> to vector<16x4xf32>
    %16 = arith.addf %13, %15 : vector<16x4xf32>
    %17 = vector.shape_cast %16 : vector<16x4xf32> to vector<2x8x4xf32>
    %cst_16 = arith.constant dense<0xFF800000> : vector<2x4xf32>
    %18 = vector.multi_reduction <maximumf>, %17, %cst_16 [1] : vector<2x8x4xf32> to vector<2x4xf32>
    %19 = vector.shape_cast %18 : vector<2x4xf32> to vector<2x1x4xf32>
    %20 = vector.broadcast %19 : vector<2x1x4xf32> to vector<2x8x4xf32>
    %21 = arith.subf %17, %20 : vector<2x8x4xf32>
    %22 = math.exp %21 : vector<2x8x4xf32>
    %cst_17 = arith.constant dense<0.000000e+00> : vector<2x4xf32>
    %23 = vector.multi_reduction <add>, %22, %cst_17 [1] : vector<2x8x4xf32> to vector<2x4xf32>
    %24 = vector.shape_cast %22 : vector<2x8x4xf32> to vector<16x4xf32>
    %c0_18 = arith.constant 0 : index
    %c0_19 = arith.constant 0 : index
    %25 = vector.load %arg10[%c0_18, %c0_19] : memref<4x32xf32, #tpu.memory_space<vmem>>, vector<4x32xf32>
    %cst_20 = arith.constant dense<0.000000e+00> : vector<16x32xf32>
    %26 = tpu.matmul %24, %25, %cst_20 {dimension_numbers = #tpu.dot_dimension_numbers<[1], [0], [0], [1], [0, 0, 1, 1], [], []>} : vector<16x4xf32>, vector<4x32xf32>, vector<16x32xf32> -> vector<16x32xf32>
    %c0_21 = arith.constant 0 : index
    %c0_22 = arith.constant 0 : index
    %27 = vector.load %arg11[%c0_21, %c0_22] : memref<2x16xf32, #tpu.memory_space<vmem>>, vector<2x16xf32>
    %28 = arith.mulf %26, %11 : vector<16x32xf32>
    %cst_23 = arith.constant dense<0.000000e+00> : vector<2x32xf32>
    %29 = tpu.matmul %27, %28, %cst_23 {dimension_numbers = #tpu.dot_dimension_numbers<[1], [0], [0], [1], [0, 0, 1, 1], [], []>} : vector<2x16xf32>, vector<16x32xf32>, vector<2x32xf32> -> vector<2x32xf32>
    %30 = tpu.reciprocal %23 {approx = true} : vector<2x4xf32> -> vector<2x4xf32>
    %c0_24 = arith.constant 0 : index
    %c0_25 = arith.constant 0 : index
    %31 = vector.load %arg10[%c0_24, %c0_25] : memref<4x32xf32, #tpu.memory_space<vmem>>, vector<4x32xf32>
    %cst_26 = arith.constant dense<0.000000e+00> : vector<2x32xf32>
    %32 = tpu.matmul %30, %31, %cst_26 {dimension_numbers = #tpu.dot_dimension_numbers<[1], [0], [0], [1], [0, 0, 1, 1], [], []>} : vector<2x4xf32>, vector<4x32xf32>, vector<2x32xf32> -> vector<2x32xf32>
    %33 = arith.mulf %29, %32 : vector<2x32xf32>
    %c0_27 = arith.constant 0 : index
    %c0_28 = arith.constant 0 : index
    %34 = vector.load %arg8[%c0_27, %c0_28] : memref<32x32xf32, #tpu.memory_space<vmem>>, vector<32x32xf32>
    %cst_29 = arith.constant dense<0.000000e+00> : vector<2x32xf32>
    %35 = tpu.matmul %33, %34, %cst_29 {dimension_numbers = #tpu.dot_dimension_numbers<[1], [0], [0], [1], [0, 0, 1, 1], [], []>} : vector<2x32xf32>, vector<32x32xf32>, vector<2x32xf32> -> vector<2x32xf32>
    %c0_30 = arith.constant 0 : index
    %c0_31 = arith.constant 0 : index
    %36 = vector.load %arg9[%c0_30, %c0_31] : memref<1x32xf32, #tpu.memory_space<vmem>>, vector<1x32xf32>
    %37 = vector.broadcast %36 : vector<1x32xf32> to vector<2x32xf32>
    %38 = arith.addf %35, %37 : vector<2x32xf32>
    %c0_32 = arith.constant 0 : index
    %c0_33 = arith.constant 0 : index
    %39 = vector.load %arg12[%c0_32, %c0_33] : memref<2x32xf32, #tpu.memory_space<vmem>>, vector<2x32xf32>
    tpu.vector_store %arg12[%c0_32, %c0_33], %38 {strides = array<i32>} : memref<2x32xf32, #tpu.memory_space<vmem>>, vector<2x32xf32>,
    return
  }
  func.func @transform_0(%arg0: i32) -> (i32, i32, i32) {
    %c0_i32 = arith.constant 0 : i32
    %c0_i32_0 = arith.constant 0 : i32
    %c0_i32_1 = arith.constant 0 : i32
    return %arg0, %c0_i32, %c0_i32_0 : i32, i32, i32
  }
  func.func @transform_1(%arg0: i32) -> (i32, i32) {
    %c0_i32 = arith.constant 0 : i32
    %c0_i32_0 = arith.constant 0 : i32
    return %arg0, %c0_i32 : i32, i32
  }
  func.func @transform_2(%arg0: i32) -> (i32, i32) {
    %c0_i32 = arith.constant 0 : i32
    %c0_i32_0 = arith.constant 0 : i32
    %c0_i32_1 = arith.constant 0 : i32
    return %c0_i32, %c0_i32_0 : i32, i32
  }
  func.func @transform_3(%arg0: i32) -> (i32, i32) {
    %c0_i32 = arith.constant 0 : i32
    %c0_i32_0 = arith.constant 0 : i32
    %c0_i32_1 = arith.constant 0 : i32
    return %c0_i32, %c0_i32_0 : i32, i32
  }
  func.func @transform_4(%arg0: i32) -> (i32, i32) {
    %c0_i32 = arith.constant 0 : i32
    %c0_i32_0 = arith.constant 0 : i32
    %c0_i32_1 = arith.constant 0 : i32
    return %c0_i32, %c0_i32_0 : i32, i32
  }
  func.func @transform_5(%arg0: i32) -> (i32, i32) {
    %c0_i32 = arith.constant 0 : i32
    %c0_i32_0 = arith.constant 0 : i32
    %c0_i32_1 = arith.constant 0 : i32
    return %c0_i32, %c0_i32_0 : i32, i32
  }
  func.func @transform_6(%arg0: i32) -> (i32, i32) {
    %c0_i32 = arith.constant 0 : i32
    %c0_i32_0 = arith.constant 0 : i32
    %c0_i32_1 = arith.constant 0 : i32
    return %c0_i32, %c0_i32_0 : i32, i32
  }
  func.func @transform_7(%arg0: i32) -> (i32, i32) {
    %c0_i32 = arith.constant 0 : i32
    %c0_i32_0 = arith.constant 0 : i32
    %c0_i32_1 = arith.constant 0 : i32
    return %c0_i32, %c0_i32_0 : i32, i32
  }
  func.func @transform_8(%arg0: i32) -> (i32, i32) {
    %c0_i32 = arith.constant 0 : i32
    %c0_i32_0 = arith.constant 0 : i32
    %c0_i32_1 = arith.constant 0 : i32
    return %c0_i32, %c0_i32_0 : i32, i32
  }
  func.func @transform_9(%arg0: i32) -> (i32, i32) {
    %c0_i32 = arith.constant 0 : i32
    %c0_i32_0 = arith.constant 0 : i32
    %c0_i32_1 = arith.constant 0 : i32
    return %c0_i32, %c0_i32_0 : i32, i32
  }
  func.func @transform_10(%arg0: i32) -> (i32, i32) {
    %c0_i32 = arith.constant 0 : i32
    %c0_i32_0 = arith.constant 0 : i32
    %c0_i32_1 = arith.constant 0 : i32
    return %c0_i32, %c0_i32_0 : i32, i32
  }
  func.func @transform_11(%arg0: i32) -> (i32, i32) {
    %c0_i32 = arith.constant 0 : i32
    %c0_i32_0 = arith.constant 0 : i32
    return %arg0, %c0_i32 : i32, i32
  }
}

</mosaic_0001>

<bundles_post_ra>
// kernel: tpu_custom_call.1
= control target key start
LH: loop header
LB: loop body
LE: loop exit
PB: predicated region body
PF: predicated region fallthrough
CT: control target
= control target key end

     0   :  { %16 = vsyncpa [#allocation3], 0  ;;  %s1189_s0 = inlined_call_operand.hbm [shape: f32[2,8,32], index: 0, kind: input, shape index: {}]   ;;  %s1190_s1 = inlined_call_operand.vmem [shape: f32[16,1], index: 1, kind: input, shape index: {}]   ;;  %s1191_s2 = inlined_call_operand.vmem [shape: f32[32,4], index: 2, kind: input, shape index: {}]   ;;  %s1192_s3 = inlined_call_operand.vmem [shape: f32[32,32], index: 3, kind: input, shape index: {}]   ;;  %s1193_s4 = inlined_call_operand.hbm [shape: f32[1,32], index: 4, kind: input, shape index: {}]   ;;  %s1194_s5 = inlined_call_operand.vmem [shape: f32[32,32], index: 5, kind: input, shape index: {}]   ;;  %s1195_s6 = inlined_call_operand.vmem [shape: f32[1,32], index: 6, kind: input, shape index: {}]   ;;  %s1196_s7 = inlined_call_operand.hbm [shape: f32[32,32], index: 7, kind: input, shape index: {}]   ;;  %s1197_s8 = inlined_call_operand.vmem [shape: f32[1,32], index: 8, kind: input, shape index: {}]   ;;  %s1198_s9 = inlined_call_operand.vmem [shape: f32[4,32], index: 9, kind: input, shape index: {}]   ;;  %s1199_s10 = inlined_call_operand.vmem [shape: f32[2,16], index: 10, kind: input, shape index: {}]   ;;  %s1200_s11 = inlined_call_operand.hbm [shape: f32[2,32], index: 11, kind: output, shape index: {}]  }
   0x1   :  { %17 = vsyncpa [#allocation6], 0 }
   0x2   :  { %18 = vsyncpa [#allocation4], 0  ;;  %s989_s17 = smov [#allocation5]   ;;  %s990_s19 = smov [#allocation2]  }
   0x3   :  { %s43_s18 = sshll.u32 %s989_s17, 4  ;;  %s24_s20 = sshll.u32 %s990_s19, 4  ;;  %s44_s18 = int_to_ptr.vmem [resolvable:$true] %s43_s18  ;;  %s1059_s20 = int_to_ptr.vmem [resolvable:$true] %s24_s20 }
   0x4   :  { %s895_s23 = scalar_lea.hbm %s1193_s4, 16 }
   0x5   :  { %p896_p0 = scmp.ne.s32.totalorder %s1193_s4, %s895_s23  ;;  %p899_p1 = scmp.lt.u32.totalorder %s895_s23, %s1193_s4 }
   0x7   :  { %p901_p2 = pnand %p899_p1, %p896_p0 }
   0x9   :  { %904 = shalt.err (!%p901_p2)
}
   0xa   :  { %s905_s28 = scalar_lea.vmem %s44_s18, 16  ;;  %s909_s29 = scalar_lea.vmem %s44_s18, 32 }
   0xb   :  { %p906_p3 = scmp.ne.s32.totalorder %s44_s18, %s905_s28  ;;  %p910_p4 = scmp.lt.s32.totalorder %s44_s18, %s44_s18 }
   0xc   :  { %p911_p5 = scmp.lt.s32.totalorder %s909_s29, %s905_s28 }
   0xe   :  { %p912_p6 = por %p911_p5, %p910_p4 }
  0x10   :  { %p913_p7 = pnand %p912_p6, %p906_p3 }
  0x12   :  { %916 = shalt.err (!%p913_p7)
}
  0x13   :  { %46 = dma.hbm_to_vmem [thread:$0]  %s1193_s4, 16, %s44_s18, [#allocation6]  }
  0x14   :  { %s917_s15 = scalar_lea.hbm %s1189_s0, 256 }
  0x15   :  { %p918_p8 = scmp.ne.s32.totalorder %s1189_s0, %s917_s15  ;;  %p921_p9 = scmp.lt.u32.totalorder %s917_s15, %s1189_s0 }
  0x17   :  { %p923_p10 = pnand %p921_p9, %p918_p8 }
  0x19   :  { %926 = shalt.err (!%p923_p10)
}
  0x1a   :  { %s927_s22 = scalar_lea.vmem %s1059_s20, 256  ;;  %p932_p12 = scmp.lt.s32.totalorder %s1059_s20, %s1059_s20 }
  0x1b   :  { %p928_p11 = scmp.ne.s32.totalorder %s1059_s20, %s927_s22  ;;  %p933_p13 = scmp.lt.s32.totalorder %s927_s22, %s927_s22 }
  0x1d   :  { %p934_p0 = por %p933_p13, %p932_p12 }
  0x1f   :  { %p935_p1 = pnand %p934_p0, %p928_p11 }
  0x21   :  { %938 = shalt.err (!%p935_p1)
}
  0x22   :  { %s991_s4 = smov 128   ;;  %s992_s18 = smov 8  }
  0x23   :  { %30 = dma.hbm_to_vmem [thread:$0]  %s1189_s0, 256, %s1059_s20, [#allocation3], %s991_s4, %s991_s4, %s992_s18  }
  0x24   :  { %s993_s25 = smov [#allocation7]   ;;  %s939_s29 = scalar_lea.hbm %s1196_s7, 512 }
  0x25   :  { %s56_s26 = sshll.u32 %s993_s25, 4  ;;  %p940_p2 = scmp.ne.s32.totalorder %s1196_s7, %s939_s29  ;;  %s57_s26 = int_to_ptr.vmem [resolvable:$true] %s56_s26 }
  0x26   :  { %p943_p3 = scmp.lt.u32.totalorder %s939_s29, %s1196_s7 }
  0x28   :  { %p945_p4 = pnand %p943_p3, %p940_p2 }
  0x2a   :  { %948 = shalt.err (!%p945_p4)
}
  0x2b   :  { %s949_s15 = scalar_lea.vmem %s57_s26, 512  ;;  %p954_p6 = scmp.lt.s32.totalorder %s57_s26, %s57_s26 }
  0x2c   :  { %p950_p5 = scmp.ne.s32.totalorder %s57_s26, %s949_s15  ;;  %p955_p7 = scmp.lt.s32.totalorder %s949_s15, %s949_s15 }
  0x2e   :  { %p956_p8 = por %p955_p7, %p954_p6 }
  0x30   :  { %p957_p9 = pnand %p956_p8, %p950_p5 }
  0x32   :  { %960 = shalt.err (!%p957_p9)
}
  0x33   :  { %62 = dma.hbm_to_vmem [thread:$0]  %s1196_s7, 512, %s57_s26, [#allocation6], %s991_s4, %s991_s4, %s992_s18  }
  0x34   :  { %983 = dma.done.wait [#allocation3], 256  }
  0x35   :  { %984 = vsyncadd [#allocation3], 4294967040 }
  0x36   :  { %985 = dma.done.wait [#allocation6], 528  }
  0x37   :  { %986 = vsyncadd [#allocation6], 4294966768  ;;  %vm91_vm0 = vcmask 261120   ;;  %v80_v0 = vld [vmem:[%s1192_s3] sm:$0xff]  ;;  %v81_v1 = vld [vmem:[%s1192_s3 + $0x8] sm:$0xff]  ;;  %v994_v15 = vmov 0  }
  0x38   :  { %v82_v2 = vld [vmem:[%s1192_s3 + $0x10] sm:$0xff]  ;;  %v843_v3 = vpack.c.bf16 %v81_v1, %v80_v0  ;;  %v83_v4 = vld [vmem:[%s1192_s3 + $0x18] sm:$0xff]  ;;  %v78_v5 = vld [vmem:[#allocation2] sm:$0xff]  ;;  %886 = vset.pattern.permute.xlu0 %v994_v15  ;;  %vm398_vm1 = vcmask 1043456   ;;  %v995_v29 = vmov 0.0   ;;  %vm996_vm2 = vmmov 0  }
  0x39   :  { %v847_v6 = vpack.c.bf16 %v83_v4, %v82_v2  ;;  %790 = vmatprep.mubr.msk.f32.mxu0 %vm91_vm0, %v78_v5  ;;  %v259_v7 = vld [vmem:[%s1191_s2] sm:$0xff]  ;;  %v260_v8 = vld [vmem:[%s1191_s2 + $0x8] sm:$0xff]  ;;  %801 = vmatprep.mubr.msk.f32.mxu1 %vm91_vm0, %v78_v5  ;;  %v261_v11 = vld [vmem:[%s1191_s2 + $0x10] sm:$0xff]  ;;  %vm356_vm3 = vcmask 31744   ;;  %vm558_vm4 = vcmask 1041409   ;;  %vm480_vm5 = vcmask 130048  }
  0x3a   :  { %844 = vmatprep.subr.bf16.mxu0 %v843_v3  ;;  %v859_v9 = vpack.c.bf16 %v260_v8, %v259_v7  ;;  %v79_v10 = vld [vmem:[#allocation2 + $0x8] sm:$0xff]  ;;  %v262_v12 = vld [vmem:[%s1191_s2 + $0x18] sm:$0xff]  ;;  %v263_v14 = vld [vmem:[%s1190_s1] sm:$0xff]  ;;  %s998_s7 = smov [#allocation8]   ;;  %vm717_vm6 = vcmask 254976  }
  0x3b   :  { %846 = vmatpush3.bf16.msra.mxu0 %v843_v3  ;;  %v863_v13 = vpack.c.bf16 %v262_v12, %v261_v11  ;;  %267 = vperm.xlu0 %886, %v263_v14   ;;  %v264_v16 = vld [vmem:[%s1190_s1 + $0x8] sm:$0xff]  ;;  %v735_v17 = vld [vmem:[#allocation5] ss:$0 sm:$0xff]  ;;  %v173_v22 = vld [vmem:[%s1194_s5] sm:$0xff]  ;;  %v997_v11 = vmov 0.0|0.0   ;;  %s725_s4 = sshll.u32 %s998_s7, 4  ;;  %s726_s4 = int_to_ptr.vmem [resolvable:$true] %s725_s4 }
  0x3c   :  { %848 = vmatprep.subr.bf16.mxu0 %v847_v6  ;;  %v174_v23 = vld [vmem:[%s1194_s5 + $0x8] sm:$0xff]  ;;  %v175_v25 = vld [vmem:[%s1194_s5 + $0x10] sm:$0xff]  ;;  %v176_v26 = vld [vmem:[%s1194_s5 + $0x18] sm:$0xff]  ;;  %s961_s18 = scalar_lea.vmem %s726_s4, 32  ;;  %p966_p11 = scmp.lt.s32.totalorder %s726_s4, %s726_s4 }
  0x3d   :  { %v851_v24 = vpack.c.bf16 %v174_v23, %v173_v22  ;;  %v855_v27 = vpack.c.bf16 %v176_v26, %v175_v25  ;;  %v391_v28 = vld [vmem:[%s1198_s9] sm:$0xf]  ;;  %p962_p10 = scmp.ne.s32.totalorder %s726_s4, %s961_s18  ;;  %p967_p12 = scmp.lt.s32.totalorder %s961_s18, %s961_s18 }
  0x3e   :  { %v738_v12 = vld [vmem:[%s1195_s6] ss:$0 sm:$0xff]  ;;  %v635_v26 = vld [vmem:[#allocation7 + $0x10] sm:$0xff] }
  0x3f   :  { %850 = vmatpush3.bf16.msra.mxu0 %v847_v6  ;;  %272 = vperm.xlu0 %886, %v264_v16   ;;  %v477_v22 = vld [vmem:[%s1199_s10] sm:$0x3]  ;;  %p968_p13 = por %p967_p12, %p966_p11 }
  0x40   :  { %860 = vmatprep.subr.bf16.mxu0 %v859_v9  ;;  %852 = vmatprep.subr.bf16.mxu1 %v851_v24 }
  0x41   :  { %854 = vmatpush3.bf16.msra.mxu1 %v851_v24  ;;  %p969_p0 = pnand %p968_p13, %p962_p10 }
  0x42   :  { %791 = vmatmul.mubr.msk.f32.vlgmr.msra.gmra.mrb[0].mxu0 %vm91_vm0, %v79_v10  ;;  %856 = vmatprep.subr.bf16.mxu1 %v855_v27 }
  0x43   :  { %862 = vmatpush3.bf16.msra.mxu0 %v859_v9 }
  0x44   :  { %864 = vmatprep.subr.bf16.mxu0 %v863_v13 }
  0x45   :  { %858 = vmatpush3.bf16.msra.mxu1 %v855_v27  ;;  %v636_v27 = vld [vmem:[#allocation7 + $0x18] sm:$0xff] }
  0x46   :  { %815 = vmatprep.subr.msk.mxu1 %vm398_vm1, %v391_v28 }
  0x47   :  { %866 = vmatpush3.bf16.msra.mxu0 %v863_v13 }
  0x48   :  { %802 = vmatmul.mubr.msk.f32.vlgmr.msra.gmra.mrb[0].mxu1 %vm91_vm0, %v79_v10  ;;  %827 = vmatprep.subr.mxu0 %v995_v29 }
  0x49   :  { %816 = vmatpush3.msk.msra.mxu1 %vm398_vm1, %v391_v28 }
  0x4a   :  { %867 = vmatprep.subr.bf16.mxu1 %v997_v11 }
  0xba   :  { %v268_v30 = vpop.permute.xlu0 %267 }
  0xbe   :  { %v273_v31 = vpop.permute.xlu0 %272 }
 0x115   :  { %v792_v18 = vpop.f32.mrb[0].mxu0 }
 0x116   :  { %v164_v19 = vpop.f32.mrb[1].mxu0  ;;  %v170_v21 = vadd.f32 %v792_v18, %v735_v17 }
 0x117   :  { %v165_v20 = vadd.f32 %v735_v17, %v164_v19  ;;  %v633_v19 = vld [vmem:[#allocation7] sm:$0xff] }
 0x119   :  { %812 = vmatprep.mubr.msk.f32.mxu0 %vm91_vm0, %v165_v20  ;;  %v634_v20 = vld [vmem:[#allocation7 + $0x8] sm:$0xff] }
 0x11a   :  { %813 = vmatmul.mubr.msk.f32.vlgmr.msra.gmra.mrb[2].mxu0 %vm91_vm0, %v170_v21  ;;  %v871_v23 = vpack.c.bf16 %v634_v20, %v633_v19 }
 0x11b   :  { %829 = vmatprep.mubr.msk.f32.mxu0 %vm996_vm2, %v995_v29  ;;  %828 = vmatpush3.msk.msra.mxu0 %vm398_vm1, %v391_v28  ;;  %v803_v9 = vpop.f32.mrb[0].mxu1  ;;  %v874_v28 = vpack.c.bf16 %v636_v27, %v635_v26 }
 0x11c   :  { %v250_v10 = vpop.f32.mrb[1].mxu1  ;;  %v256_v13 = vadd.f32 %v803_v9, %v738_v12 }
 0x11d   :  { %v251_v14 = vadd.f32 %v738_v12, %v250_v10 }
 0x1ed   :  { %v814_v32 = vpop.f32.mrb[2].mxu0 }
 0x1ee   :  { %v353_v33 = vadd.f32 %v814_v32, %v273_v31  ;;  %v347_v34 = vpop.f32.mrb[3].mxu0 }
 0x1ef   :  { %v348_v35 = vadd.f32 %v347_v34, %v268_v30 }
 0x1f0   :  { %v364_v36 = vsel %vm356_vm3, %v353_v33, -inf }
 0x1f1   :  { %v365_v37 = vrot.slane %v364_v36, 4  ;;  %v357_v38 = vsel %vm356_vm3, %v348_v35, -inf }
 0x1f2   :  { %v358_v39 = vrot.slane %v357_v38, 4 }
 0x1f3   :  { %v366_v40 = vmax.f32 %v364_v36, %v365_v37 }
 0x1f4   :  { %v359_v41 = vmax.f32 %v357_v38, %v358_v39 }
 0x1f5   :  { %v367_v42 = vrot.slane %v366_v40, 2 }
 0x1f6   :  { %v360_v43 = vrot.slane %v359_v41, 2 }
 0x1f7   :  { %v368_v44 = vmax.f32 %v366_v40, %v367_v42 }
 0x1f8   :  { %v361_v45 = vmax.f32 %v359_v41, %v360_v43 }
 0x1f9   :  { %v369_v46 = vrot.slane %v368_v44, 1 }
 0x1fa   :  { %v362_v47 = vrot.slane %v361_v45, 1 }
 0x1fb   :  { %v370_v48 = vmax.f32 %v368_v44, %v369_v46 }
 0x1fc   :  { %v363_v49 = vmax.f32 %v361_v45, %v362_v47 }
 0x1fd   :  { %v372_v50 = vsub.f32 %v353_v33, %v370_v48  ;;  %v749_v33 = vld [vmem:[%s1197_s8] ss:$0 sm:$0xff] }
 0x1fe   :  { %v371_v51 = vsub.f32 %v348_v35, %v363_v49 }
 0x1ff   :  { %v375_v52 = vmul.f32 1.442695, %v372_v50 }
 0x200   :  { %v373_v53 = vmul.f32 1.442695, %v371_v51 }
 0x201   :  { %887 = vpow2.f32 %v375_v52 }
 0x202   :  { %889 = vpow2.f32 %v373_v53 }
 0x20b   :  { %v888_v54 = vpop.eup %887 }
 0x20c   :  { %v890_v55 = vpop.eup %889  ;;  %v384_v56 = vsel %vm356_vm3, %v888_v54, 0.0 }
 0x20d   :  { %v385_v57 = vrot.slane %v384_v56, 4  ;;  %v377_v58 = vsel %vm356_vm3, %v890_v55, 0.0  ;;  %817 = vmatprep.mubr.msk.f32.mxu1 %vm356_vm3, %v890_v55 }
 0x20e   :  { %v378_v59 = vrot.slane %v377_v58, 4  ;;  %818 = vmatmul.mubr.msk.f32.vlgmr.msra.gmra.mrb[2].mxu1 %vm356_vm3, %v888_v54 }
 0x20f   :  { %v386_v60 = vadd.f32 %v385_v57, %v384_v56  ;;  %824 = vmatprep.mubr.msk.f32.mxu1 %vm996_vm2, %v995_v29 }
 0x210   :  { %v379_v61 = vadd.f32 %v378_v59, %v377_v58 }
 0x211   :  { %v387_v62 = vrot.slane %v386_v60, 2 }
 0x212   :  { %v380_v63 = vrot.slane %v379_v61, 2 }
 0x213   :  { %v388_v0 = vadd.f32 %v387_v62, %v386_v60 }
 0x214   :  { %v381_v1 = vadd.f32 %v380_v63, %v379_v61 }
 0x215   :  { %v389_v2 = vrot.slane %v388_v0, 1 }
 0x216   :  { %v382_v3 = vrot.slane %v381_v1, 1 }
 0x217   :  { %v390_v4 = vadd.f32 %v389_v2, %v388_v0 }
 0x218   :  { %v383_v5 = vadd.f32 %v382_v3, %v381_v1 }
 0x219   :  { %891 = vrcp.f32 %v390_v4 }
 0x21a   :  { %893 = vrcp.f32 %v383_v5 }
 0x223   :  { %v892_v6 = vpop.eup %891 }
 0x224   :  { %v894_v7 = vpop.eup %893 }
 0x225   :  { %v559_v8 = vsel %vm558_vm4, %v892_v6, %v894_v7 }
 0x226   :  { %830 = vmatmul.mubr.msk.f32.vlgmr.msra.gmra.mrb[4].mxu0 %vm356_vm3, %v559_v8 }
 0x2e1   :  { %v819_v15 = vpop.f32.mrb[2].mxu1 }
 0x2e2   :  { %v479_v16 = vmul.f32 %v819_v15, %v256_v13  ;;  %v468_v17 = vpop.f32.mrb[3].mxu1 }
 0x2e3   :  { %v478_v18 = vmul.f32 %v468_v17, %v251_v14 }
 0x2e5   :  { %v868_v21 = vpack.c.bf16 %v479_v16, %v478_v18 }
 0x2e7   :  { %869 = vmatpush3.bf16.msra.mxu1 %v868_v21 }
 0x2e8   :  { %870 = vmatprep.subr.bf16.mxu1 %v997_v11 }
 0x2ea   :  { %825 = vmatmul.mubr.msk.f32.vlgmr.msra.gmra.mrb[4].mxu1 %vm480_vm5, %v477_v22 }
 0x2eb   :  { %872 = vmatpush3.bf16.msra.mxu1 %v871_v23  ;;  %840 = vmatprep.mubr.msk.f32.mxu1 %vm996_vm2, %v995_v29 }
 0x2ec   :  { %873 = vmatprep.subr.bf16.mxu1 %v997_v11 }
 0x2ef   :  { %875 = vmatpush3.bf16.msra.mxu1 %v874_v28 }
 0x2f9   :  { %v628_v24 = vpop.f32.mrb[4].mxu0 }
 0x2fa   :  { %v831_v25 = vpop.f32.mrb[5].mxu0 }
 0x3bd   :  { %v550_v30 = vpop.f32.mrb[4].mxu1 }
 0x3be   :  { %v632_v31 = vmul.f32 %v628_v24, %v550_v30  ;;  %v826_v32 = vpop.f32.mrb[5].mxu1 }
 0x3c0   :  { %841 = vmatmul.mubr.msk.f32.vlgmr.msra.gmra.mrb[6].mxu1 %vm91_vm0, %v632_v31 }
 0x493   :  { %v713_v34 = vpop.f32.mrb[6].mxu1 }
 0x494   :  { %v714_v29 = vadd.f32 %v749_v33, %v713_v34  ;;  %v842_v35 = vpop.f32.mrb[7].mxu1 }
 0x496   :  { %718 = vst.msk [vmem:[#allocation8] sm:$0x3] %vm717_vm6, %v714_v29 }
 0x497   :  { %972 = shalt.err (!%p969_p0)
}
 0x498   :  { %s973_s3 = scalar_lea.hbm %s1200_s11, 32 }
 0x499   :  { %p974_p1 = scmp.ne.s32.totalorder %s1200_s11, %s973_s3  ;;  %p977_p2 = scmp.lt.u32.totalorder %s973_s3, %s1200_s11 }
 0x49b   :  { %p979_p3 = pnand %p977_p2, %p974_p1 }
 0x49d   :  { %982 = shalt.err (!%p979_p3)
}
 0x49e   :  { %728 = dma.vmem_to_hbm [thread:$0]  %s726_s4, 32, %s1200_s11, [#allocation4]  }
 0x49f   :  { %987 = dma.done.wait [#allocation4], 32  }
 0x4a0   :  { %988 = vsyncadd [#allocation4], 4294967264 }
 0x4a1   :  { %732 = vsyncpa [#allocation3], 1 }
 0x4a2   :  { %733 = vsyncpa [#allocation6], 1 }
 0x4a3   :  { %734 = vsyncpa [#allocation4], 1 }

// kernel: tpu_custom_call.1
= control target key start
LH: loop header
LB: loop body
LE: loop exit
PB: predicated region body
PF: predicated region fallthrough
CT: control target
= control target key end

     0   :  { %16 = vsyncpa [#allocation3], 0  ;;  %s1189_s0 = inlined_call_operand.hbm [shape: f32[2,8,32], index: 0, kind: input, shape index: {}]   ;;  %s1190_s1 = inlined_call_operand.vmem [shape: f32[16,1], index: 1, kind: input, shape index: {}]   ;;  %s1191_s2 = inlined_call_operand.vmem [shape: f32[32,4], index: 2, kind: input, shape index: {}]   ;;  %s1192_s3 = inlined_call_operand.vmem [shape: f32[32,32], index: 3, kind: input, shape index: {}]   ;;  %s1193_s4 = inlined_call_operand.hbm [shape: f32[1,32], index: 4, kind: input, shape index: {}]   ;;  %s1194_s5 = inlined_call_operand.vmem [shape: f32[32,32], index: 5, kind: input, shape index: {}]   ;;  %s1195_s6 = inlined_call_operand.vmem [shape: f32[1,32], index: 6, kind: input, shape index: {}]   ;;  %s1196_s7 = inlined_call_operand.hbm [shape: f32[32,32], index: 7, kind: input, shape index: {}]   ;;  %s1197_s8 = inlined_call_operand.vmem [shape: f32[1,32], index: 8, kind: input, shape index: {}]   ;;  %s1198_s9 = inlined_call_operand.vmem [shape: f32[4,32], index: 9, kind: input, shape index: {}]   ;;  %s1199_s10 = inlined_call_operand.vmem [shape: f32[2,16], index: 10, kind: input, shape index: {}]   ;;  %s1200_s11 = inlined_call_operand.hbm [shape: f32[2,32], index: 11, kind: output, shape index: {}]  }
   0x1   :  { %17 = vsyncpa [#allocation6], 0 }
   0x2   :  { %18 = vsyncpa [#allocation4], 0  ;;  %s989_s17 = smov [#allocation5]   ;;  %s990_s19 = smov [#allocation2]  }
   0x3   :  { %s43_s18 = sshll.u32 %s989_s17, 4  ;;  %s24_s20 = sshll.u32 %s990_s19, 4  ;;  %s44_s18 = int_to_ptr.vmem [resolvable:$true] %s43_s18  ;;  %s1059_s20 = int_to_ptr.vmem [resolvable:$true] %s24_s20 }
   0x4   :  { %s895_s23 = scalar_lea.hbm %s1193_s4, 16 }
   0x5   :  { %p896_p0 = scmp.ne.s32.totalorder %s1193_s4, %s895_s23  ;;  %p899_p1 = scmp.lt.u32.totalorder %s895_s23, %s1193_s4 }
   0x7   :  { %p901_p2 = pnand %p899_p1, %p896_p0 }
   0x9   :  { %904 = shalt.err (!%p901_p2)
}
   0xa   :  { %s905_s28 = scalar_lea.vmem %s44_s18, 16  ;;  %s909_s29 = scalar_lea.vmem %s44_s18, 32 }
   0xb   :  { %p906_p3 = scmp.ne.s32.totalorder %s44_s18, %s905_s28  ;;  %p910_p4 = scmp.lt.s32.totalorder %s44_s18, %s44_s18 }
   0xc   :  { %p911_p5 = scmp.lt.s32.totalorder %s909_s29, %s905_s28 }
   0xe   :  { %p912_p6 = por %p911_p5, %p910_p4 }
  0x10   :  { %p913_p7 = pnand %p912_p6, %p906_p3 }
  0x12   :  { %916 = shalt.err (!%p913_p7)
}
  0x13   :  { %46 = dma.hbm_to_vmem [thread:$0]  %s1193_s4, 16, %s44_s18, [#allocation6]  }
  0x14   :  { %s917_s15 = scalar_lea.hbm %s1189_s0, 256 }
  0x15   :  { %p918_p8 = scmp.ne.s32.totalorder %s1189_s0, %s917_s15  ;;  %p921_p9 = scmp.lt.u32.totalorder %s917_s15, %s1189_s0 }
  0x17   :  { %p923_p10 = pnand %p921_p9, %p918_p8 }
  0x19   :  { %926 = shalt.err (!%p923_p10)
}
  0x1a   :  { %s927_s22 = scalar_lea.vmem %s1059_s20, 256  ;;  %p932_p12 = scmp.lt.s32.totalorder %s1059_s20, %s1059_s20 }
  0x1b   :  { %p928_p11 = scmp.ne.s32.totalorder %s1059_s20, %s927_s22  ;;  %p933_p13 = scmp.lt.s32.totalorder %s927_s22, %s927_s22 }
  0x1d   :  { %p934_p0 = por %p933_p13, %p932_p12 }
  0x1f   :  { %p935_p1 = pnand %p934_p0, %p928_p11 }
  0x21   :  { %938 = shalt.err (!%p935_p1)
}
  0x22   :  { %s991_s4 = smov 128   ;;  %s992_s18 = smov 8  }
  0x23   :  { %30 = dma.hbm_to_vmem [thread:$0]  %s1189_s0, 256, %s1059_s20, [#allocation3], %s991_s4, %s991_s4, %s992_s18  }
  0x24   :  { %s993_s25 = smov [#allocation7]   ;;  %s939_s29 = scalar_lea.hbm %s1196_s7, 512 }
  0x25   :  { %s56_s26 = sshll.u32 %s993_s25, 4  ;;  %p940_p2 = scmp.ne.s32.totalorder %s1196_s7, %s939_s29  ;;  %s57_s26 = int_to_ptr.vmem [resolvable:$true] %s56_s26 }
  0x26   :  { %p943_p3 = scmp.lt.u32.totalorder %s939_s29, %s1196_s7 }
  0x28   :  { %p945_p4 = pnand %p943_p3, %p940_p2 }
  0x2a   :  { %948 = shalt.err (!%p945_p4)
}
  0x2b   :  { %s949_s15 = scalar_lea.vmem %s57_s26, 512  ;;  %p954_p6 = scmp.lt.s32.totalorder %s57_s26, %s57_s26 }
  0x2c   :  { %p950_p5 = scmp.ne.s32.totalorder %s57_s26, %s949_s15  ;;  %p955_p7 = scmp.lt.s32.totalorder %s949_s15, %s949_s15 }
  0x2e   :  { %p956_p8 = por %p955_p7, %p954_p6 }
  0x30   :  { %p957_p9 = pnand %p956_p8, %p950_p5 }
  0x32   :  { %960 = shalt.err (!%p957_p9)
}
  0x33   :  { %62 = dma.hbm_to_vmem [thread:$0]  %s1196_s7, 512, %s57_s26, [#allocation6], %s991_s4, %s991_s4, %s992_s18  }
  0x34   :  { %983 = dma.done.wait [#allocation3], 256  }
  0x35   :  { %984 = vsyncadd [#allocation3], 4294967040 }
  0x36   :  { %985 = dma.done.wait [#allocation6], 528  }
  0x37   :  { %986 = vsyncadd [#allocation6], 4294966768  ;;  %vm91_vm0 = vcmask 261120   ;;  %v80_v0 = vld [vmem:[%s1192_s3] sm:$0xff]  ;;  %v81_v1 = vld [vmem:[%s1192_s3 + $0x8] sm:$0xff]  ;;  %v994_v15 = vmov 0  }
  0x38   :  { %v82_v2 = vld [vmem:[%s1192_s3 + $0x10] sm:$0xff]  ;;  %v843_v3 = vpack.c.bf16 %v81_v1, %v80_v0  ;;  %v83_v4 = vld [vmem:[%s1192_s3 + $0x18] sm:$0xff]  ;;  %v78_v5 = vld [vmem:[#allocation2] sm:$0xff]  ;;  %886 = vset.pattern.permute.xlu0 %v994_v15  ;;  %vm398_vm1 = vcmask 1043456   ;;  %v995_v29 = vmov 0.0   ;;  %vm996_vm2 = vmmov 0  }
  0x39   :  { %v847_v6 = vpack.c.bf16 %v83_v4, %v82_v2  ;;  %790 = vmatprep.mubr.msk.f32.mxu0 %vm91_vm0, %v78_v5  ;;  %v259_v7 = vld [vmem:[%s1191_s2] sm:$0xff]  ;;  %v260_v8 = vld [vmem:[%s1191_s2 + $0x8] sm:$0xff]  ;;  %801 = vmatprep.mubr.msk.f32.mxu1 %vm91_vm0, %v78_v5  ;;  %v261_v11 = vld [vmem:[%s1191_s2 + $0x10] sm:$0xff]  ;;  %vm356_vm3 = vcmask 31744   ;;  %vm558_vm4 = vcmask 1041409   ;;  %vm480_vm5 = vcmask 130048  }
  0x3a   :  { %844 = vmatprep.subr.bf16.mxu0 %v843_v3  ;;  %v859_v9 = vpack.c.bf16 %v260_v8, %v259_v7  ;;  %v79_v10 = vld [vmem:[#allocation2 + $0x8] sm:$0xff]  ;;  %v262_v12 = vld [vmem:[%s1191_s2 + $0x18] sm:$0xff]  ;;  %v263_v14 = vld [vmem:[%s1190_s1] sm:$0xff]  ;;  %s998_s7 = smov [#allocation8]   ;;  %vm717_vm6 = vcmask 254976  }
  0x3b   :  { %846 = vmatpush3.bf16.msra.mxu0 %v843_v3  ;;  %v863_v13 = vpack.c.bf16 %v262_v12, %v261_v11  ;;  %267 = vperm.xlu0 %886, %v263_v14   ;;  %v264_v16 = vld [vmem:[%s1190_s1 + $0x8] sm:$0xff]  ;;  %v735_v17 = vld [vmem:[#allocation5] ss:$0 sm:$0xff]  ;;  %v173_v22 = vld [vmem:[%s1194_s5] sm:$0xff]  ;;  %v997_v11 = vmov 0.0|0.0   ;;  %s725_s4 = sshll.u32 %s998_s7, 4  ;;  %s726_s4 = int_to_ptr.vmem [resolvable:$true] %s725_s4 }
  0x3c   :  { %848 = vmatprep.subr.bf16.mxu0 %v847_v6  ;;  %v174_v23 = vld [vmem:[%s1194_s5 + $0x8] sm:$0xff]  ;;  %v175_v25 = vld [vmem:[%s1194_s5 + $0x10] sm:$0xff]  ;;  %v176_v26 = vld [vmem:[%s1194_s5 + $0x18] sm:$0xff]  ;;  %s961_s18 = scalar_lea.vmem %s726_s4, 32  ;;  %p966_p11 = scmp.lt.s32.totalorder %s726_s4, %s726_s4 }
  0x3d   :  { %v851_v24 = vpack.c.bf16 %v174_v23, %v173_v22  ;;  %v855_v27 = vpack.c.bf16 %v176_v26, %v175_v25  ;;  %v391_v28 = vld [vmem:[%s1198_s9] sm:$0xf]  ;;  %p962_p10 = scmp.ne.s32.totalorder %s726_s4, %s961_s18  ;;  %p967_p12 = scmp.lt.s32.totalorder %s961_s18, %s961_s18 }
  0x3e   :  { %v738_v12 = vld [vmem:[%s1195_s6] ss:$0 sm:$0xff]  ;;  %v635_v26 = vld [vmem:[#allocation7 + $0x10] sm:$0xff] }
  0x3f   :  { %850 = vmatpush3.bf16.msra.mxu0 %v847_v6  ;;  %272 = vperm.xlu0 %886, %v264_v16   ;;  %v477_v22 = vld [vmem:[%s1199_s10] sm:$0x3]  ;;  %p968_p13 = por %p967_p12, %p966_p11 }
  0x40   :  { %860 = vmatprep.subr.bf16.mxu0 %v859_v9  ;;  %852 = vmatprep.subr.bf16.mxu1 %v851_v24 }
  0x41   :  { %854 = vmatpush3.bf16.msra.mxu1 %v851_v24  ;;  %p969_p0 = pnand %p968_p13, %p962_p10 }
  0x42   :  { %791 = vmatmul.mubr.msk.f32.vlgmr.msra.gmra.mrb[0].mxu0 %vm91_vm0, %v79_v10  ;;  %856 = vmatprep.subr.bf16.mxu1 %v855_v27 }
  0x43   :  { %862 = vmatpush3.bf16.msra.mxu0 %v859_v9 }
  0x44   :  { %864 = vmatprep.subr.bf16.mxu0 %v863_v13 }
  0x45   :  { %858 = vmatpush3.bf16.msra.mxu1 %v855_v27  ;;  %v636_v27 = vld [vmem:[#allocation7 + $0x18] sm:$0xff] }
  0x46   :  { %815 = vmatprep.subr.msk.mxu1 %vm398_vm1, %v391_v28 }
  0x47   :  { %866 = vmatpush3.bf16.msra.mxu0 %v863_v13 }
  0x48   :  { %802 = vmatmul.mubr.msk.f32.vlgmr.msra.gmra.mrb[0].mxu1 %vm91_vm0, %v79_v10  ;;  %827 = vmatprep.subr.mxu0 %v995_v29 }
  0x49   :  { %816 = vmatpush3.msk.msra.mxu1 %vm398_vm1, %v391_v28 }
  0x4a   :  { %867 = vmatprep.subr.bf16.mxu1 %v997_v11 }
  0xba   :  { %v268_v30 = vpop.permute.xlu0 %267 }
  0xbe   :  { %v273_v31 = vpop.permute.xlu0 %272 }
 0x115   :  { %v792_v18 = vpop.f32.mrb[0].mxu0 }
 0x116   :  { %v164_v19 = vpop.f32.mrb[1].mxu0  ;;  %v170_v21 = vadd.f32 %v792_v18, %v735_v17 }
 0x117   :  { %v165_v20 = vadd.f32 %v735_v17, %v164_v19  ;;  %v633_v19 = vld [vmem:[#allocation7] sm:$0xff] }
 0x119   :  { %812 = vmatprep.mubr.msk.f32.mxu0 %vm91_vm0, %v165_v20  ;;  %v634_v20 = vld [vmem:[#allocation7 + $0x8] sm:$0xff] }
 0x11a   :  { %813 = vmatmul.mubr.msk.f32.vlgmr.msra.gmra.mrb[2].mxu0 %vm91_vm0, %v170_v21  ;;  %v871_v23 = vpack.c.bf16 %v634_v20, %v633_v19 }
 0x11b   :  { %829 = vmatprep.mubr.msk.f32.mxu0 %vm996_vm2, %v995_v29  ;;  %828 = vmatpush3.msk.msra.mxu0 %vm398_vm1, %v391_v28  ;;  %v803_v9 = vpop.f32.mrb[0].mxu1  ;;  %v874_v28 = vpack.c.bf16 %v636_v27, %v635_v26 }
 0x11c   :  { %v250_v10 = vpop.f32.mrb[1].mxu1  ;;  %v256_v13 = vadd.f32 %v803_v9, %v738_v12 }
 0x11d   :  { %v251_v14 = vadd.f32 %v738_v12, %v250_v10 }
 0x1ed   :  { %v814_v32 = vpop.f32.mrb[2].mxu0 }
 0x1ee   :  { %v353_v33 = vadd.f32 %v814_v32, %v273_v31  ;;  %v347_v34 = vpop.f32.mrb[3].mxu0 }
 0x1ef   :  { %v348_v35 = vadd.f32 %v347_v34, %v268_v30 }
 0x1f0   :  { %v364_v36 = vsel %vm356_vm3, %v353_v33, -inf }
 0x1f1   :  { %v365_v37 = vrot.slane %v364_v36, 4  ;;  %v357_v38 = vsel %vm356_vm3, %v348_v35, -inf }
 0x1f2   :  { %v358_v39 = vrot.slane %v357_v38, 4 }
 0x1f3   :  { %v366_v40 = vmax.f32 %v364_v36, %v365_v37 }
 0x1f4   :  { %v359_v41 = vmax.f32 %v357_v38, %v358_v39 }
 0x1f5   :  { %v367_v42 = vrot.slane %v366_v40, 2 }
 0x1f6   :  { %v360_v43 = vrot.slane %v359_v41, 2 }
 0x1f7   :  { %v368_v44 = vmax.f32 %v366_v40, %v367_v42 }
 0x1f8   :  { %v361_v45 = vmax.f32 %v359_v41, %v360_v43 }
 0x1f9   :  { %v369_v46 = vrot.slane %v368_v44, 1 }
 0x1fa   :  { %v362_v47 = vrot.slane %v361_v45, 1 }
 0x1fb   :  { %v370_v48 = vmax.f32 %v368_v44, %v369_v46 }
 0x1fc   :  { %v363_v49 = vmax.f32 %v361_v45, %v362_v47 }
 0x1fd   :  { %v372_v50 = vsub.f32 %v353_v33, %v370_v48  ;;  %v749_v33 = vld [vmem:[%s1197_s8] ss:$0 sm:$0xff] }
 0x1fe   :  { %v371_v51 = vsub.f32 %v348_v35, %v363_v49 }
 0x1ff   :  { %v375_v52 = vmul.f32 1.442695, %v372_v50 }
 0x200   :  { %v373_v53 = vmul.f32 1.442695, %v371_v51 }
 0x201   :  { %887 = vpow2.f32 %v375_v52 }
 0x202   :  { %889 = vpow2.f32 %v373_v53 }
 0x20b   :  { %v888_v54 = vpop.eup %887 }
 0x20c   :  { %v890_v55 = vpop.eup %889  ;;  %v384_v56 = vsel %vm356_vm3, %v888_v54, 0.0 }
 0x20d   :  { %v385_v57 = vrot.slane %v384_v56, 4  ;;  %v377_v58 = vsel %vm356_vm3, %v890_v55, 0.0  ;;  %817 = vmatprep.mubr.msk.f32.mxu1 %vm356_vm3, %v890_v55 }
 0x20e   :  { %v378_v59 = vrot.slane %v377_v58, 4  ;;  %818 = vmatmul.mubr.msk.f32.vlgmr.msra.gmra.mrb[2].mxu1 %vm356_vm3, %v888_v54 }
 0x20f   :  { %v386_v60 = vadd.f32 %v385_v57, %v384_v56  ;;  %824 = vmatprep.mubr.msk.f32.mxu1 %vm996_vm2, %v995_v29 }
 0x210   :  { %v379_v61 = vadd.f32 %v378_v59, %v377_v58 }
 0x211   :  { %v387_v62 = vrot.slane %v386_v60, 2 }
 0x212   :  { %v380_v63 = vrot.slane %v379_v61, 2 }
 0x213   :  { %v388_v0 = vadd.f32 %v387_v62, %v386_v60 }
 0x214   :  { %v381_v1 = vadd.f32 %v380_v63, %v379_v61 }
 0x215   :  { %v389_v2 = vrot.slane %v388_v0, 1 }
 0x216   :  { %v382_v3 = vrot.slane %v381_v1, 1 }
 0x217   :  { %v390_v4 = vadd.f32 %v389_v2, %v388_v0 }
 0x218   :  { %v383_v5 = vadd.f32 %v382_v3, %v381_v1 }
 0x219   :  { %891 = vrcp.f32 %v390_v4 }
 0x21a   :  { %893 = vrcp.f32 %v383_v5 }
 0x223   :  { %v892_v6 = vpop.eup %891 }
 0x224   :  { %v894_v7 = vpop.eup %893 }
 0x225   :  { %v559_v8 = vsel %vm558_vm4, %v892_v6, %v894_v7 }
 0x226   :  { %830 = vmatmul.mubr.msk.f32.vlgmr.msra.gmra.mrb[4].mxu0 %vm356_vm3, %v559_v8 }
 0x2e1   :  { %v819_v15 = vpop.f32.mrb[2].mxu1 }
 0x2e2   :  { %v479_v16 = vmul.f32 %v819_v15, %v256_v13  ;;  %v468_v17 = vpop.f32.mrb[3].mxu1 }
 0x2e3   :  { %v478_v18 = vmul.f32 %v468_v17, %v251_v14 }
 0x2e5   :  { %v868_v21 = vpack.c.bf16 %v479_v16, %v478_v18 }
 0x2e7   :  { %869 = vmatpush3.bf16.msra.mxu1 %v868_v21 }
 0x2e8   :  { %870 = vmatprep.subr.bf16.mxu1 %v997_v11 }
 0x2ea   :  { %825 = vmatmul.mubr.msk.f32.vlgmr.msra.gmra.mrb[4].mxu1 %vm480_vm5, %v477_v22 }
 0x2eb   :  { %872 = vmatpush3.bf16.msra.mxu1 %v871_v23  ;;  %840 = vmatprep.mubr.msk.f32.mxu1 %vm996_vm2, %v995_v29 }
 0x2ec   :  { %873 = vmatprep.subr.bf16.mxu1 %v997_v11 }
 0x2ef   :  { %875 = vmatpush3.bf16.msra.mxu1 %v874_v28 }
 0x2f9   :  { %v628_v24 = vpop.f32.mrb[4].mxu0 }
 0x2fa   :  { %v831_v25 = vpop.f32.mrb[5].mxu0 }
 0x3bd   :  { %v550_v30 = vpop.f32.mrb[4].mxu1 }
 0x3be   :  { %v632_v31 = vmul.f32 %v628_v24, %v550_v30  ;;  %v826_v32 = vpop.f32.mrb[5].mxu1 }
 0x3c0   :  { %841 = vmatmul.mubr.msk.f32.vlgmr.msra.gmra.mrb[6].mxu1 %vm91_vm0, %v632_v31 }
 0x493   :  { %v713_v34 = vpop.f32.mrb[6].mxu1 }
 0x494   :  { %v714_v29 = vadd.f32 %v749_v33, %v713_v34  ;;  %v842_v35 = vpop.f32.mrb[7].mxu1 }
 0x496   :  { %718 = vst.msk [vmem:[#allocation8] sm:$0x3] %vm717_vm6, %v714_v29 }
 0x497   :  { %972 = shalt.err (!%p969_p0)
}
 0x498   :  { %s973_s3 = scalar_lea.hbm %s1200_s11, 32 }
 0x499   :  { %p974_p1 = scmp.ne.s32.totalorder %s1200_s11, %s973_s3  ;;  %p977_p2 = scmp.lt.u32.totalorder %s973_s3, %s1200_s11 }
 0x49b   :  { %p979_p3 = pnand %p977_p2, %p974_p1 }
 0x49d   :  { %982 = shalt.err (!%p979_p3)
}
 0x49e   :  { %728 = dma.vmem_to_hbm [thread:$0]  %s726_s4, 32, %s1200_s11, [#allocation4]  }
 0x49f   :  { %987 = dma.done.wait [#allocation4], 32  }
 0x4a0   :  { %988 = vsyncadd [#allocation4], 4294967264 }
 0x4a1   :  { %732 = vsyncpa [#allocation3], 1 }
 0x4a2   :  { %733 = vsyncpa [#allocation6], 1 }
 0x4a3   :  { %734 = vsyncpa [#allocation4], 1 }

</bundles_post_ra>
